<compile_context>
chip_gen: v7x
topology: tpu7x:2x2x1
jax: 0.10.0
libtpu: 0.0.40
codegen_flags: <defaults>
</compile_context>

<pallas_src>
import functools

import jax
import jax.numpy as jnp
from jax import lax
from jax.experimental import pallas as pl
from jax.experimental.pallas import tpu as pltpu


def _choose_tb(B, F, itemsize):
    """Pick a batch-block size so one tile is ~2 MiB (capped), multiple of 8."""
    target_bytes = 2 * 1024 * 1024
    tb = target_bytes // max(1, F * itemsize)
    tb = max(8, (tb // 8) * 8)
    tb = min(tb, 1024)
    if tb >= B:
        return B  # single block covering the whole batch (full-extent block is always legal)
    return tb


def w_norm_loss(latent, latent_avg=None, start_from_latent_avg=True, block_b=None):
    """Pallas implementation of WNormLoss.forward."""
    B, N, D = latent.shape
    F = N * D
    subtract = bool(start_from_latent_avg) and (latent_avg is not None)

    itemsize = jnp.dtype(latent.dtype).itemsize
    if block_b is not None and block_b < B:
        TB = max(8, (int(block_b) // 8) * 8)
    else:
        TB = _choose_tb(B, F, itemsize)

    num_blocks = -(-B // TB)
    B_pad = num_blocks * TB
    needs_mask = B_pad != B

    lat2d = latent.reshape(B, F)
    if needs_mask:
        lat2d = jnp.pad(lat2d, ((0, B_pad - B), (0, 0)))

    def kernel(*refs):
        if subtract:
            latent_ref, avg_ref, out_ref = refs
        else:
            latent_ref, out_ref = refs

        x = latent_ref[...].astype(jnp.float32)          # (TB, F)
        if subtract:
            x = x - avg_ref[...]                         # (1, F) broadcast, already f32

        ssq = jnp.sum(x * x, axis=-1, keepdims=True)     # (TB, 1) per-row sum of squares
        if needs_mask:
            row = (pl.program_id(0) * TB
                   + lax.broadcasted_iota(jnp.int32, (TB, 1), 0))
            ssq = jnp.where(row < B, ssq, 0.0)

        partial = jnp.sum(jnp.sqrt(ssq))                 # sum of per-row L2 norms in block
        out_ref[...] = jnp.broadcast_to(partial, (1, 1, 128)).astype(jnp.float32)

    in_specs = [pl.BlockSpec((TB, F), lambda i: (i, 0))]
    args = [lat2d]
    if subtract:
        in_specs.append(pl.BlockSpec((1, F), lambda i: (0, 0)))
        args.append(latent_avg.reshape(1, F).astype(jnp.float32))

    bytes_accessed = (B_pad * F * itemsize
                      + (F * 4 if subtract else 0)
                      + num_blocks * 128 * 4)
    cost = pl.CostEstimate(flops=3 * B_pad * F,
                           transcendentals=B_pad,
                           bytes_accessed=bytes_accessed)

    partials = pl.pallas_call(
        kernel,
        out_shape=jax.ShapeDtypeStruct((num_blocks, 1, 128), jnp.float32),
        grid=(num_blocks,),
        in_specs=in_specs,
        out_specs=pl.BlockSpec((1, 1, 128), lambda i: (i, 0, 0)),
        compiler_params=pltpu.CompilerParams(
            # Per-block partial outputs -> no cross-step dependency -> megacore-safe.
            dimension_semantics=("parallel",),
            vmem_limit_bytes=32 * 1024 * 1024,
        ),
        cost_estimate=cost,
    )(*args)

    return jnp.sum(partials[:, 0, 0]) / jnp.float32(B)


def w_norm_loss_ref(latent, latent_avg=None, start_from_latent_avg=True):
    """Pure-JAX reference mirroring the PyTorch module."""
    if start_from_latent_avg and latent_avg is not None:
        latent = latent - latent_avg
    lat = latent.astype(jnp.float32)
    norms = jnp.sqrt(jnp.sum(lat * lat, axis=(1, 2)))
    return jnp.sum(norms) / latent.shape[0]


if __name__ == "__main__":
    key = jax.random.PRNGKey(0)
    k1, k2, k3 = jax.random.split(key, 3)

    # Case 1: small W+ latent, single full-batch block (no padding path).
    B, N, D = 2, 8, 32
    latent = jax.random.normal(k1, (B, N, D), dtype=jnp.float32)
    latent_avg = jax.random.normal(k2, (N, D), dtype=jnp.float32)

    loss = w_norm_loss(latent, latent_avg, start_from_latent_avg=True)
    loss = jax.block_until_ready(loss)
    ref = w_norm_loss_ref(latent, latent_avg, start_from_latent_avg=True)
    assert jnp.allclose(loss, ref, rtol=1e-5, atol=1e-5), (loss, ref)

    # Case 2: batch not divisible by the block -> exercises padding + in-kernel mask,
    # with the avg subtraction active (padded rows must not contribute).
    B2 = 10
    latent2 = jax.random.normal(k3, (B2, N, D), dtype=jnp.float32)
    loss2 = w_norm_loss(latent2, latent_avg, start_from_latent_avg=True, block_b=8)
    loss2 = jax.block_until_ready(loss2)
    ref2 = w_norm_loss_ref(latent2, latent_avg, start_from_latent_avg=True)
    assert jnp.allclose(loss2, ref2, rtol=1e-5, atol=1e-5), (loss2, ref2)

    # Case 3: no latent_avg subtraction -> kernel variant without the avg input.
    loss3 = w_norm_loss(latent, None, start_from_latent_avg=False)
    loss3 = jax.block_until_ready(loss3)
    ref3 = w_norm_loss_ref(latent, None, start_from_latent_avg=False)
    assert jnp.allclose(loss3, ref3, rtol=1e-5, atol=1e-5), (loss3, ref3)

    print("KERNEL_OK")
</pallas_src>

<mosaic_0001>
module attributes {stable_mosaic.version = 11 : i64} {
  func.func @kernel(%arg0: i32, %arg1: memref<2x256xf32, #tpu.memory_space<vmem>>, %arg2: memref<1x256xf32, #tpu.memory_space<vmem>>, %arg3: memref<1x1x128xf32, #tpu.memory_space<vmem>>) attributes {dimension_semantics = [#tpu.dimension_semantics<parallel>], iteration_bounds = array<i64: 1>, scalar_prefetch = 0 : i64, scratch_operands = 0 : i64, tpu.core_type = #tpu.core_type<tc>, window_params = [{transform_indices = @transform_0, window_bounds = array<i64: 2, 256>}, {pipeline_mode = #tpu.pipeline_mode<synchronous>, transform_indices = @transform_1, window_bounds = array<i64: 1, 256>}, {transform_indices = @transform_2, window_bounds = array<i64: 1, 1, 128>}]} {
    %c0 = arith.constant 0 : index
    %c0_0 = arith.constant 0 : index
    %0 = vector.load %arg1[%c0, %c0_0] : memref<2x256xf32, #tpu.memory_space<vmem>>, vector<2x256xf32>
    %c0_1 = arith.constant 0 : index
    %c0_2 = arith.constant 0 : index
    %1 = vector.load %arg2[%c0_1, %c0_2] : memref<1x256xf32, #tpu.memory_space<vmem>>, vector<1x256xf32>
    %2 = vector.broadcast %1 : vector<1x256xf32> to vector<2x256xf32>
    %3 = arith.subf %0, %2 : vector<2x256xf32>
    %4 = arith.mulf %3, %3 : vector<2x256xf32>
    %cst = arith.constant dense<0.000000e+00> : vector<2xf32>
    %5 = vector.multi_reduction <add>, %4, %cst [1] : vector<2x256xf32> to vector<2xf32>
    %6 = vector.shape_cast %5 : vector<2xf32> to vector<2x1xf32>
    %7 = math.sqrt %6 : vector<2x1xf32>
    %8 = vector.shape_cast %7 : vector<2x1xf32> to vector<1x2x1xf32>
    %cst_3 = arith.constant dense<0.000000e+00> : vector<1xf32>
    %9 = vector.multi_reduction <add>, %8, %cst_3 [1, 2] : vector<1x2x1xf32> to vector<1xf32>
    %10 = vector.shape_cast %9 : vector<1xf32> to vector<1x1x1xf32>
    %11 = vector.extract %10[0, 0, 0] : f32 from vector<1x1x1xf32>
    %12 = vector.broadcast %11 : f32 to vector<1x1x128xf32>
    %c0_4 = arith.constant 0 : index
    %c0_5 = arith.constant 0 : index
    %c0_6 = arith.constant 0 : index
    %13 = vector.load %arg3[%c0_4, %c0_5, %c0_6] : memref<1x1x128xf32, #tpu.memory_space<vmem>>, vector<1x1x128xf32>
    tpu.vector_store %arg3[%c0_4, %c0_5, %c0_6], %12 {strides = array<i32>} : memref<1x1x128xf32, #tpu.memory_space<vmem>>, vector<1x1x128xf32>,
    return
  }
  func.func @transform_0(%arg0: i32) -> (i32, i32) {
    %c0_i32 = arith.constant 0 : i32
    %c0_i32_0 = arith.constant 0 : i32
    return %arg0, %c0_i32 : i32, i32
  }
  func.func @transform_1(%arg0: i32) -> (i32, i32) {
    %c0_i32 = arith.constant 0 : i32
    %c0_i32_0 = arith.constant 0 : i32
    %c0_i32_1 = arith.constant 0 : i32
    return %c0_i32, %c0_i32_0 : i32, i32
  }
  func.func @transform_2(%arg0: i32) -> (i32, i32, i32) {
    %c0_i32 = arith.constant 0 : i32
    %c0_i32_0 = arith.constant 0 : i32
    %c0_i32_1 = arith.constant 0 : i32
    return %arg0, %c0_i32, %c0_i32_0 : i32, i32, i32
  }
}

</mosaic_0001>

<bundles_post_ra>
// kernel: tpu_custom_call.1
= control target key start
LH: loop header
LB: loop body
LE: loop exit
PB: predicated region body
PF: predicated region fallthrough
CT: control target
= control target key end

     0   :  { %7 = vsyncpa [#allocation3], 0  ;;  %s198_s0 = inlined_call_operand.hbm [shape: f32[2,256], index: 0, kind: input, shape index: {}]   ;;  %s199_s1 = inlined_call_operand.vmem [shape: f32[1,256], index: 1, kind: input, shape index: {}]   ;;  %s200_s2 = inlined_call_operand.hbm [shape: f32[1,1,128], index: 2, kind: output, shape index: {}]  }
   0x1   :  { %8 = vsyncpa [#allocation4], 0  ;;  %s153_s9 = smov [#allocation2]   ;;  %s105_s13 = scalar_lea.hbm %s198_s0, 64 }
   0x2   :  { %s15_s10 = sshll.u32 %s153_s9, 4  ;;  %p106_p0 = scmp.ne.s32.totalorder %s198_s0, %s105_s13  ;;  %s16_s10 = int_to_ptr.vmem [resolvable:$true] %s15_s10 }
   0x3   :  { %p109_p1 = scmp.lt.u32.totalorder %s105_s13, %s198_s0 }
   0x5   :  { %p111_p2 = pnand %p109_p1, %p106_p0 }
   0x7   :  { %114 = shalt.err (!%p111_p2)
}
   0x8   :  { %s115_s18 = scalar_lea.vmem %s16_s10, 64  ;;  %p120_p4 = scmp.lt.s32.totalorder %s16_s10, %s16_s10 }
   0x9   :  { %p116_p3 = scmp.ne.s32.totalorder %s16_s10, %s115_s18  ;;  %p121_p5 = scmp.lt.s32.totalorder %s115_s18, %s115_s18 }
   0xb   :  { %p122_p6 = por %p121_p5, %p120_p4 }
   0xd   :  { %p123_p7 = pnand %p122_p6, %p116_p3 }
   0xf   :  { %126 = shalt.err (!%p123_p7)
}
  0x10   :  { %18 = dma.hbm_to_vmem [thread:$0]  %s198_s0, 64, %s16_s10, [#allocation3]  }
  0x11   :  { %149 = dma.done.wait [#allocation3], 64  }
  0x12   :  { %150 = vsyncadd [#allocation3], 4294967232  ;;  %v27_v0 = vlaneseq  ;;  %v154_v1 = vmov 1983009808   ;;  %v25_v7 = vld [vmem:[%s199_s1] sm:$0x3] }
  0x13   :  { %v37_v2 = vunpack.c.l.s4 %v154_v1  ;;  %v24_v12 = vld [vmem:[#allocation2] sm:$0xf]  ;;  %vm57_vm0 = vcmask 1041408   ;;  %vm70_vm2 = vcmask 1024   ;;  %s155_s0 = smov [#allocation5]  }
  0x14   :  { %v28_v3 = vshrl.u32 %v27_v0, 7  ;;  %s89_s1 = sshll.u32 %s155_s0, 4  ;;  %s90_s1 = int_to_ptr.vmem [resolvable:$true] %s89_s1 }
  0x15   :  { %v38_v6 = vunpack.c.0.s8 %v37_v2  ;;  %s127_s24 = scalar_lea.vmem %s90_s1, 16  ;;  %s131_s25 = scalar_lea.vmem %s90_s1, 32 }
  0x16   :  { %v29_v4 = vsub.s32 0, %v28_v3  ;;  %v33_v5 = vsub.s32 1, %v28_v3  ;;  %p128_p8 = scmp.ne.s32.totalorder %s90_s1, %s127_s24  ;;  %p132_p9 = scmp.lt.s32.totalorder %s90_s1, %s90_s1 }
  0x17   :  { %v41_v10 = vsub.s32 %v38_v6, %v28_v3  ;;  %p133_p10 = scmp.lt.s32.totalorder %s131_s25, %s127_s24 }
  0x18   :  { %v30_v8 = vrot.slane %v25_v7, %v29_v4  ;;  %v34_v9 = vrot.slane %v25_v7, %v33_v5 }
  0x19   :  { %p134_p11 = por %p133_p10, %p132_p9 }
  0x1a   :  { %v35_v11 = vcombine.low %v30_v8, %v34_v9 }
  0x1b   :  { %p135_p12 = pnand %p134_p11, %p128_p8 }
  0x1c   :  { %v42_v13 = vrot.slane %v35_v11, %v41_v10 }
  0x1e   :  { %v44_v14 = vsub.f32 %v24_v12, %v42_v13 }
  0x20   :  { %v45_v15 = vmul.f32 %v44_v14, %v44_v14 }
  0x22   :  { %v53_v16 = vrot.slane %v45_v15, %v41_v10 }
  0x24   :  { %v54_v17 = vcombine.high %v53_v16, %v53_v16  ;;  %v58_v18 = vsel %vm57_vm0, %v53_v16, 0.0 }
  0x26   :  { %v59_v19 = vsel %vm57_vm0, %v54_v17, 0.0 }
  0x27   :  { %v60_v20 = vadd.f32 %v59_v19, %v58_v18 }
  0x29   :  { %61 = vadd.xlane.f32.xlu0 %v60_v20 }
  0xb6   :  { %v62_v21 = vpop.xlane.xlu0 %61 }
  0xb7   :  { %103 = vrsqrt.f32 %v62_v21  ;;  %vm65_vm1 = vcmp.eq.f32.partialorder %v62_v21, inf  ;;  %v68_v24 = vand.u32 2147483648, %v62_v21  ;;  %vm67_vm3 = vcmp.eq.f32.partialorder %v62_v21, 0.0 }
  0xc1   :  { %v104_v22 = vpop.eup %103 }
  0xc2   :  { %v64_v23 = vmul.f32 %v104_v22, %v62_v21 }
  0xc4   :  { %v66_v25 = vsel %vm65_vm1, %v62_v21, %v64_v23 }
  0xc5   :  { %v69_v26 = vsel %vm67_vm3, %v68_v24, %v66_v25 }
  0xc6   :  { %v71_v27 = vsel %vm70_vm2, %v69_v26, 0.0 }
  0xc7   :  { %72 = vadd.xlane.f32.xlu0 %v71_v27 }
 0x154   :  { %v73_v28 = vpop.xlane.xlu0 %72 }
 0x155   :  { %v74_v29 = vrot.slane %v73_v28, 4 }
 0x157   :  { %v75_v30 = vadd.f32 %v74_v29, %v73_v28 }
 0x159   :  { %v76_v31 = vrot.slane %v75_v30, 2 }
 0x15b   :  { %v77_v32 = vadd.f32 %v76_v31, %v75_v30 }
 0x15d   :  { %v78_v33 = vrot.slane %v77_v32, 1 }
 0x15f   :  { %v79_v34 = vadd.f32 %v78_v33, %v77_v32 }
 0x161   :  { %98 = vpush %v79_v34 }
 0x192   :  { %s99_s23 = spop %98 }
 0x193   :  { %v81_v35 = vstv %s99_s23 }
 0x194   :  { %82 = vst [vmem:[#allocation5] sm:$0x1] %v81_v35 }
 0x195   :  { %138 = shalt.err (!%p135_p12)
}
 0x196   :  { %s139_s28 = scalar_lea.hbm %s200_s2, 16 }
 0x197   :  { %p140_p13 = scmp.ne.s32.totalorder %s200_s2, %s139_s28  ;;  %p143_p0 = scmp.lt.u32.totalorder %s139_s28, %s200_s2 }
 0x199   :  { %p145_p1 = pnand %p143_p0, %p140_p13 }
 0x19b   :  { %148 = shalt.err (!%p145_p1)
}
 0x19c   :  { %92 = dma.vmem_to_hbm [thread:$0]  %s90_s1, 16, %s200_s2, [#allocation4]  }
 0x19d   :  { %151 = dma.done.wait [#allocation4], 16  }
 0x19e   :  { %152 = vsyncadd [#allocation4], 4294967280 }
 0x19f   :  { %96 = vsyncpa [#allocation3], 1 }
 0x1a0   :  { %97 = vsyncpa [#allocation4], 1 }

</bundles_post_ra>
